<compile_context>
chip_gen: v6e
topology: v6e:2x2x1
jax: 0.10.0
libtpu: 0.0.40
codegen_flags: <defaults>
</compile_context>

<pallas_src>
import math
import numpy as np
import jax
import jax.numpy as jnp
from jax.experimental import pallas as pl
from jax.experimental.pallas import tpu as pltpu


# ----------------------------------------------------------------------------
# Host-side (numpy / float64) construction of the padding-folded filter matrices
# ----------------------------------------------------------------------------

def _reflect_index(i, n):
    if i < 0:
        return -i
    if i >= n:
        return 2 * n - 2 - i
    return i


def _replicate_index(i, n):
    return min(max(i, 0), n - 1)


def _slice_filter_taps(kernel_size, filter_type, gauss_std, sinc_bw):
    """Normalized 1-D taps of WeightedSliceFilter.conv (sinc / sinc-hamming / gauss)."""
    K = int(kernel_size)
    assert K % 2 == 1, K
    if filter_type.startswith('sinc'):
        t = np.arange(-(K // 2), K // 2 + 1, dtype=np.float64)
        k = np.sinc(2.0 * sinc_bw * t)  # sin(2*pi*bw*t)/(2*pi*bw*t), == 1 at t == 0
        if filter_type.endswith('hamming') and K > 1:
            k = k * (0.54 - 0.46 * np.cos(2.0 * np.pi * (t + K // 2) / (K - 1)))
    elif filter_type.startswith('gauss'):
        c = np.arange(K, dtype=np.float64)
        mean = (K - 1) / 2.0
        k = np.exp(-(c - mean) ** 2 / (2.0 * float(gauss_std) ** 2))
    else:
        raise AssertionError(filter_type)
    return k / k.sum()


def _gaussian_taps(sigma, kernel_size):
    """Normalized 1-D factor of InplaneGaussian's (exactly separable) 2-D kernel."""
    c = np.arange(kernel_size, dtype=np.float64)
    mean = (kernel_size - 1) / 2.0
    g = np.exp(-(c - mean) ** 2 / (2.0 * float(sigma) ** 2))
    return g / g.sum()


def _folded_filter_matrix(taps, n, boundary):
    """Left-multiply matrix M (n, n): out[d] = sum_s M[d, s] * v[s] == 1-D
    cross-correlation with `taps`, out-of-range sources folded back per `boundary`."""
    K = len(taps)
    p = K // 2
    assert p < n, (K, n)
    fold = _reflect_index if boundary == 'reflect' else _replicate_index
    M = np.zeros((n, n), np.float64)
    for d in range(n):
        for j in range(K):
            M[d, fold(d - p + j, n)] += taps[j]
    return M


def _slice_filter_matrices(taps, n, boundary, outside_fill):
    """Right-multiply matrices (n, n) for the weighted W-axis filter, padding folded in:
         num[.., w] = (x*m) @ TW + x @ RW   (RW: reflect/replicate edge taps * outside_fill)
         den[.., w] = m @ MW + b[w]         (b: constant-pad contribution to mask_conv)
    """
    K = len(taps)
    p = K // 2
    if boundary == 'reflect':
        assert p < n, (K, n)
    fold = _reflect_index if boundary == 'reflect' else _replicate_index
    TW = np.zeros((n, n), np.float64)
    RW = np.zeros((n, n), np.float64)
    MW = np.zeros((n, n), np.float64)
    b = np.zeros((n,), np.float64)
    for d in range(n):
        for j in range(K):
            s = d - p + j
            if 0 <= s < n:
                TW[s, d] += taps[j]
                MW[s, d] += 1.0 / K
            else:
                RW[fold(s, n), d] += taps[j] * outside_fill
                b[d] += outside_fill / K
    return TW, RW, MW, b


def _build_filter_constants(D, H, W, *, kernel_size, weight_smooth, padding,
                            filter_type, gauss_std, sinc_bw, outside_fill, smooth):
    taps = _slice_filter_taps(kernel_size, filter_type, gauss_std, sinc_bw)
    TW, RW, MW, b = _slice_filter_matrices(taps, W, padding, outside_fill)
    consts = dict(TW=TW, RW=RW, MW=MW, b=b)
    if smooth:
        kg = int(math.ceil(weight_smooth) * 2 + 1)
        assert kg % 2 == 1, kg
        assert kg // 2 < D and kg // 2 < H, "InplaneGaussian reflect pad needs pad < dim"
        g1 = _gaussian_taps(weight_smooth, kg)
        consts['GD'] = _folded_filter_matrix(g1, D, 'reflect')
        consts['GH'] = _folded_filter_matrix(g1, H, 'reflect')
    return consts


# ----------------------------------------------------------------------------
# Pallas kernels
# ----------------------------------------------------------------------------

def _make_mask_dpass_kernel(clamp_value):
    """Kernel A: clamp (optional) + Gaussian D-pass (reflect folded) on the MXU.
    Refs: gd (D, D), m (D, thw lane-dense tile of H*W), o (D, thw)."""
    def kernel(gd_ref, m_ref, o_ref):
        m = m_ref[...].astype(jnp.float32)
        if clamp_value is not None:
            m = jnp.maximum(m, clamp_value)
        o_ref[...] = jnp.dot(gd_ref[...], m, preferred_element_type=jnp.float32)
    return kernel


def _make_slice_filter_kernel(td, H, W, smooth_mask, fix_zero_support, emit_support):
    """Kernel B: Gaussian H-pass (batched MXU matmul over the D-tile) + weighted
    sinc W-filter + support division.  Blocks are (td*H, W); the (td*H, W) <->
    (td, H, W) reshapes are leading-dim splits/merges (layout no-ops for H % 8 == 0)."""
    def kernel(gh_ref, tw_ref, rw_ref, mw_ref, bs_ref, x_ref, m_ref, o_ref, *sup_refs):
        f32 = jnp.float32
        x2 = x_ref[...].astype(f32)          # (td*H, W)
        m2 = m_ref[...].astype(f32)          # (td*H, W)
        if smooth_mask:
            m3 = m2.reshape(td, H, W)
            # ms[t, h, w] = sum_k GH[h, k] * m[t, k, w]  (reflect folded into GH)
            ms3 = jnp.einsum('thk,tkw->thw', gh_ref[...], m3,
                             preferred_element_type=f32)
            ms2 = ms3.reshape(td * H, W)
        else:
            ms2 = m2
        xm2 = x2 * ms2
        num = jnp.dot(xm2, tw_ref[...], preferred_element_type=f32)
        num = num + jnp.dot(x2, rw_ref[...], preferred_element_type=f32)
        den = jnp.dot(ms2, mw_ref[...], preferred_element_type=f32) + bs_ref[...]
        if fix_zero_support:
            den = jnp.where(den == 0.0, 1.0, den)
        o_ref[...] = (num / den).astype(o_ref.dtype)
        if emit_support:
            sup_refs[0][...] = den.astype(sup_refs[0].dtype)
    return kernel


def _inplane_gaussian_dpass(mask_bdhw, gd, clamp_value, hw_block):
    """mask_bdhw: (B, D, H*W) view; gd: (D, D) reflect-folded Gaussian (left-multiply)."""
    Bv, Dv, HWv = mask_bdhw.shape
    if hw_block is None or int(hw_block) >= HWv:
        thw = HWv
    else:
        thw = max(128, (int(hw_block) // 128) * 128)
    nhw = pl.cdiv(HWv, thw)
    kernel = _make_mask_dpass_kernel(clamp_value)
    return pl.pallas_call(
        kernel,
        out_shape=jax.ShapeDtypeStruct((Bv, Dv, HWv), jnp.float32),
        grid=(Bv, nhw),
        in_specs=[
            pl.BlockSpec((Dv, Dv), lambda b, t: (0, 0)),
            pl.BlockSpec((None, Dv, thw), lambda b, t: (b, 0, t)),
        ],
        out_specs=pl.BlockSpec((None, Dv, thw), lambda b, t: (b, 0, t)),
        compiler_params=pltpu.CompilerParams(
            dimension_semantics=("parallel", "parallel")),
    )(gd, mask_bdhw)


def _weighted_w_filter(x_brw, m_brw, gh_b, tw, rw, mw, bs, *, H, W, td,
                       smooth_mask, fix_zero_support, emit_support):
    """x_brw, m_brw: (B, D*H, W) views.  Grid = (B, D-tiles)."""
    Bv, DH, Wv = x_brw.shape
    Dv = DH // H
    td = max(1, min(int(td), Dv))
    nd = pl.cdiv(Dv, td)
    kernel = _make_slice_filter_kernel(td, H, Wv, smooth_mask, fix_zero_support,
                                       emit_support)

    def tile_spec():
        return pl.BlockSpec((None, td * H, Wv), lambda b, t: (b, t, 0))

    def full_spec(a):
        n = a.ndim
        return pl.BlockSpec(a.shape, lambda b, t: (0,) * n)

    out_shape = jax.ShapeDtypeStruct((Bv, DH, Wv), x_brw.dtype)
    if emit_support:
        out_shape = (out_shape, jax.ShapeDtypeStruct((Bv, DH, Wv), jnp.float32))
        out_specs = (tile_spec(), tile_spec())
    else:
        out_specs = tile_spec()

    return pl.pallas_call(
        kernel,
        out_shape=out_shape,
        grid=(Bv, nd),
        in_specs=[full_spec(gh_b), full_spec(tw), full_spec(rw),
                  full_spec(mw), full_spec(bs), tile_spec(), tile_spec()],
        out_specs=out_specs,
        compiler_params=pltpu.CompilerParams(
            dimension_semantics=("parallel", "parallel")),
    )(gh_b, tw, rw, mw, bs, x_brw, m_brw)


# ----------------------------------------------------------------------------
# Wrapper (forward pass of WeightedSliceFilter)
# ----------------------------------------------------------------------------

def weighted_slice_filter(x, mask=None, *, kernel_size=9, kernel_width=1,
                          weight_smooth=6, padding='reflect',
                          filter_type='sinc-hamming', gauss_std=1.5, sinc_bw=0.15,
                          outside_fill=0.001, ret_support=False,
                          d_block=None, hw_block=None):
    assert kernel_width == 1, "TODO, kernel_width > 1"
    assert x.ndim == 5, x.shape
    if mask is not None:
        assert mask.shape == x.shape, (mask.shape, x.shape)
    N, C, D, H, W = x.shape
    B = N * C

    smooth = (mask is not None) and bool(weight_smooth)
    clamp = float(outside_fill) if (smooth and outside_fill > 0) else None
    consts = _build_filter_constants(
        D, H, W, kernel_size=kernel_size, weight_smooth=weight_smooth,
        padding=padding, filter_type=filter_type, gauss_std=gauss_std,
        sinc_bw=sinc_bw, outside_fill=outside_fill, smooth=smooth)

    tw = jnp.asarray(consts['TW'], jnp.float32)
    rw = jnp.asarray(consts['RW'], jnp.float32)
    mw = jnp.asarray(consts['MW'], jnp.float32)
    bs = jnp.asarray(consts['b'].reshape(1, W), jnp.float32)

    x3 = x.reshape(B, D * H, W)                       # free, contiguous re-view
    if mask is None:
        m3 = jnp.ones((B, D * H, W), jnp.float32)     # torch: mask = ones_like(x)
    elif smooth:
        gd = jnp.asarray(consts['GD'], jnp.float32)
        md = _inplane_gaussian_dpass(mask.reshape(B, D, H * W), gd, clamp, hw_block)
        m3 = md.reshape(B, D * H, W)                  # free re-view between kernels
    else:
        m3 = mask.reshape(B, D * H, W)

    td = D if d_block is None else max(1, min(int(d_block), D))
    if smooth:
        gh_b = jnp.asarray(np.broadcast_to(consts['GH'], (td, H, H)), jnp.float32)
    else:
        gh_b = jnp.zeros((1, 1, 1), jnp.float32)      # unused placeholder operand

    res = _weighted_w_filter(x3, m3, gh_b, tw, rw, mw, bs, H=H, W=W, td=td,
                             smooth_mask=smooth,
                             fix_zero_support=(outside_fill <= 0),
                             emit_support=ret_support)
    if ret_support:
        out3, sup3 = res
        return out3.reshape(N, C, D, H, W), sup3.reshape(N, C, D, H, W)
    return res.reshape(N, C, D, H, W)


# ----------------------------------------------------------------------------
# Pure references (float64, host)
# ----------------------------------------------------------------------------

def _reference_forward_f64(x, mask, *, kernel_size, weight_smooth, padding,
                           filter_type, gauss_std, sinc_bw, outside_fill):
    """Literal pad + tap-loop float64 reimplementation of the PyTorch forward."""
    x = np.asarray(x, np.float64)
    N, C, D, H, W = x.shape
    K = int(kernel_size)
    p = K // 2
    taps = _slice_filter_taps(kernel_size, filter_type, gauss_std, sinc_bw)
    if mask is None:
        m = np.ones_like(x)
    else:
        m = np.asarray(mask, np.float64).copy()
        if weight_smooth:
            if outside_fill > 0:
                m = np.maximum(m, outside_fill)
            kg = int(math.ceil(weight_smooth) * 2 + 1)
            coords = np.arange(kg, dtype=np.float64)
            xg = np.tile(coords, (kg, 1))
            yg = xg.T
            mean = (kg - 1) / 2.0
            var = float(weight_smooth) ** 2
            g2 = (1.0 / (2.0 * math.pi * var)) * np.exp(
                -((xg - mean) ** 2 + (yg - mean) ** 2) / (2.0 * var))
            g2 = g2 / g2.sum()
            pg = kg // 2
            mp_ = np.pad(m, ((0, 0), (0, 0), (pg, pg), (pg, pg), (0, 0)), mode='reflect')
            sm = np.zeros_like(m)
            for i in range(kg):
                for j in range(kg):
                    sm += g2[i, j] * mp_[:, :, i:i + D, j:j + H, :]
            m = sm
    mp = np.pad(m, ((0, 0),) * 4 + ((p, p),), mode='constant',
                constant_values=outside_fill)
    xp = np.pad(x, ((0, 0),) * 4 + ((p, p),),
                mode='reflect' if padding == 'reflect' else 'edge')
    xm = xp * mp
    num = np.zeros_like(x)
    sup = np.zeros_like(x)
    for j in range(K):
        num += taps[j] * xm[..., j:j + W]
        sup += (1.0 / K) * mp[..., j:j + W]
    if outside_fill <= 0:
        sup = np.where(sup == 0.0, 1.0, sup)
    return num / sup, sup


def _matrix_forward_f64(x, mask, consts, *, smooth, clamp, fix_zero):
    """Float64 mirror of the Pallas kernels' padding-folded matrix formulation."""
    x = np.asarray(x, np.float64)
    m = np.ones_like(x) if mask is None else np.asarray(mask, np.float64)
    if smooth:
        if clamp is not None:
            m = np.maximum(m, clamp)
        m = np.einsum('dk,nckhw->ncdhw', consts['GD'], m)
        m = np.einsum('hk,ncdkw->ncdhw', consts['GH'], m)
    num = (np.einsum('ncdhk,kw->ncdhw', x * m, consts['TW'])
           + np.einsum('ncdhk,kw->ncdhw', x, consts['RW']))
    den = np.einsum('ncdhk,kw->ncdhw', m, consts['MW']) + consts['b']
    if fix_zero:
        den = np.where(den == 0.0, 1.0, den)
    return num / den, den


# ----------------------------------------------------------------------------
# Test
# ----------------------------------------------------------------------------

if __name__ == "__main__":
    key = jax.random.PRNGKey(0)
    N, C, D, H, W = 2, 1, 16, 16, 32   # C=1: PyTorch's weight_filter is built with channels=1
    kx, km = jax.random.split(key)
    x = jax.random.normal(kx, (N, C, D, H, W), dtype=jnp.float32)
    mask = jax.random.uniform(km, (N, C, D, H, W), dtype=jnp.float32)

    cfg = dict(kernel_size=9, weight_smooth=6, padding='reflect',
               filter_type='sinc-hamming', gauss_std=1.5, sinc_bw=0.15)
    fill = 1e-3

    x64 = np.asarray(x, np.float64)
    m64 = np.asarray(mask, np.float64)

    # (1) Host float64 check: padding-folded Toeplitz matrices == literal
    #     pad-and-convolve forward (validates separability + boundary folding exactly).
    consts = _build_filter_constants(D, H, W, outside_fill=fill, smooth=True, **cfg)
    mat_out, _ = _matrix_forward_f64(x64, m64, consts, smooth=True, clamp=fill,
                                     fix_zero=False)
    ref_out, ref_sup = _reference_forward_f64(x64, m64, outside_fill=fill, **cfg)
    np.testing.assert_allclose(mat_out, ref_out, rtol=1e-10, atol=1e-10)

    # (2) TPU run, masked path (InplaneGaussian mask smoothing + weighted W filter),
    #     small tiles to exercise both grid axes.  Tolerance is loose because the MXU
    #     performs f32 matmuls with bf16 passes at default precision.
    out, sup = weighted_slice_filter(x, mask, outside_fill=fill, ret_support=True,
                                     d_block=8, hw_block=256, **cfg)
    out = jax.block_until_ready(out)
    sup = jax.block_until_ready(sup)
    np.testing.assert_allclose(np.asarray(out, np.float64), ref_out, rtol=2e-2, atol=2e-2)
    np.testing.assert_allclose(np.asarray(sup, np.float64), ref_sup, rtol=2e-2, atol=2e-2)

    # (3) TPU run, mask=None path.
    out_n = weighted_slice_filter(x, None, outside_fill=fill, **cfg)
    out_n = jax.block_until_ready(out_n)
    ref_n, _ = _reference_forward_f64(x64, None, outside_fill=fill, **cfg)
    np.testing.assert_allclose(np.asarray(out_n, np.float64), ref_n, rtol=2e-2, atol=2e-2)

    print("KERNEL_OK")
</pallas_src>

<mosaic_0001>
module attributes {stable_mosaic.version = 11 : i64} {
  func.func @kernel(%arg0: i32, %arg1: i32, %arg2: memref<16x16xf32, #tpu.memory_space<vmem>>, %arg3: memref<1x16x256xf32, #tpu.memory_space<vmem>>, %arg4: memref<1x16x256xf32, #tpu.memory_space<vmem>>) attributes {dimension_semantics = [#tpu.dimension_semantics<parallel>, #tpu.dimension_semantics<parallel>], iteration_bounds = array<i64: 2, 2>, scalar_prefetch = 0 : i64, scratch_operands = 0 : i64, tpu.core_type = #tpu.core_type<tc>, window_params = [{pipeline_mode = #tpu.pipeline_mode<synchronous>, transform_indices = @transform_0, window_bounds = array<i64: 16, 16>}, {transform_indices = @transform_1, window_bounds = array<i64: 1, 16, 256>}, {transform_indices = @transform_2, window_bounds = array<i64: 1, 16, 256>}]} {
    %c0 = arith.constant 0 : index
    %c0_0 = arith.constant 0 : index
    %c0_1 = arith.constant 0 : index
    %0 = vector.load %arg3[%c0, %c0_0, %c0_1] : memref<1x16x256xf32, #tpu.memory_space<vmem>>, vector<1x16x256xf32>
    %1 = vector.shape_cast %0 : vector<1x16x256xf32> to vector<16x256xf32>
    %cst = arith.constant 1.000000e-03 : f32
    %2 = vector.broadcast %cst : f32 to vector<16x256xf32>
    %3 = arith.maximumf %1, %2 : vector<16x256xf32>
    %c0_2 = arith.constant 0 : index
    %c0_3 = arith.constant 0 : index
    %4 = vector.load %arg2[%c0_2, %c0_3] : memref<16x16xf32, #tpu.memory_space<vmem>>, vector<16x16xf32>
    %cst_4 = arith.constant dense<0.000000e+00> : vector<16x256xf32>
    %5 = tpu.matmul %4, %3, %cst_4 {dimension_numbers = #tpu.dot_dimension_numbers<[1], [0], [0], [1], [0, 0, 1, 1], [], []>} : vector<16x16xf32>, vector<16x256xf32>, vector<16x256xf32> -> vector<16x256xf32>
    %c0_5 = arith.constant 0 : index
    %c0_6 = arith.constant 0 : index
    %c0_7 = arith.constant 0 : index
    %6 = vector.load %arg4[%c0_5, %c0_6, %c0_7] : memref<1x16x256xf32, #tpu.memory_space<vmem>>, vector<1x16x256xf32>
    %7 = vector.shape_cast %6 : vector<1x16x256xf32> to vector<16x256xf32>
    %8 = vector.shape_cast %5 : vector<16x256xf32> to vector<1x16x256xf32>
    tpu.vector_store %arg4[%c0_5, %c0_6, %c0_7], %8 {strides = array<i32>} : memref<1x16x256xf32, #tpu.memory_space<vmem>>, vector<1x16x256xf32>,
    return
  }
  func.func @transform_0(%arg0: i32, %arg1: i32) -> (i32, i32) {
    %c0_i32 = arith.constant 0 : i32
    %c0_i32_0 = arith.constant 0 : i32
    %c0_i32_1 = arith.constant 0 : i32
    return %c0_i32, %c0_i32_0 : i32, i32
  }
  func.func @transform_1(%arg0: i32, %arg1: i32) -> (i32, i32, i32) {
    %c0_i32 = arith.constant 0 : i32
    %c0_i32_0 = arith.constant 0 : i32
    return %arg0, %c0_i32, %arg1 : i32, i32, i32
  }
  func.func @transform_2(%arg0: i32, %arg1: i32) -> (i32, i32, i32) {
    %c0_i32 = arith.constant 0 : i32
    %c0_i32_0 = arith.constant 0 : i32
    return %arg0, %c0_i32, %arg1 : i32, i32, i32
  }
}

</mosaic_0001>

<bundles_post_ra>
// kernel: tpu_custom_call.1
= control target key start
LH: loop header
LB: loop body
LE: loop exit
PB: predicated region body
PF: predicated region fallthrough
CT: control target
= control target key end

     0   :  { %s922_s0 = inlined_call_operand.hbm [shape: f32[16,16], index: 0, kind: input, shape index: {}]   ;;  %s923_s1 = inlined_call_operand.hbm [shape: f32[2,16,512], index: 1, kind: input, shape index: {}]   ;;  %s924_s2 = inlined_call_operand.hbm [shape: f32[2,16,512], index: 2, kind: output, shape index: {}]  }
   0x1   :  { %934 = sst [smem:[#allocation16_spill]] %s922_s0 }
   0x2   :  { %7 = vsyncpa [#allocation3], 0 }
   0x3   :  { %8 = vsyncpa [#allocation6], 0 }
   0x4   :  { %10 = vsyncpa [#allocation6 + $0x1], 0 }
   0x5   :  { %11 = vsyncpa [#allocation4], 0 }
   0x6   :  { %13 = vsyncpa [#allocation4 + $0x1], 0  ;;  %s719_s9 = smov 0   ;;  %s721_s10 = smov 0  }
   0x7   :  { %s723_s11 = smov 0   ;;  %s725_s12 = smov 0  }
   0x8   :  { %s727_s13 = smov 0   ;;  %s729_s14 = smov 0  }
   0x9   :  { %s731_s15 = smov 0   ;;  %s733_s16 = smov 0  }
   0xa LB: > { %935 = sst [smem:[#allocation11_spill]] %s662_s9  ;;  %s413_s17 = sadd.s32 4294967295, %s690_s16   ;;  %s690_s16 = sphi %s733_s16, %s19_s16   ;;  %s686_s15 = sphi %s731_s15, %s964_s15   ;;  %s682_s14 = sphi %s729_s14, %s963_s14   ;;  %s678_s13 = sphi %s727_s13, %s962_s13   ;;  %s674_s12 = sphi %s725_s12, %s957_s12   ;;  %s670_s11 = sphi %s723_s11, %s961_s11   ;;  %s666_s10 = sphi %s721_s10, %s960_s10   ;;  %s662_s9 = sphi %s719_s9, %s959_s9  }
   0xb   : > { %936 = sst [smem:[#allocation12_spill]] %s682_s14  ;;  %s414_s18 = sadd.s32 4294967294, %s690_s16  }
   0xc   : > { %937 = sst [smem:[#allocation13_spill]] %s690_s16  ;;  %p68_p0 = scmp.ne.s32.totalorder %s670_s11, %s666_s10 }
   0xd   : > { %p69_p1 = scmp.eq.s32.totalorder %s690_s16, 0  ;;  %p74_p2 = scmp.ne.s32.totalorder %s666_s10, %s662_s9 }
   0xe   : > { %p767_p3 = scmp.eq.s32.totalorder %s413_s17, 0  ;;  %p100_p4 = scmp.eq.s32.totalorder %s413_s17, 3 }
   0xf   : > { %p771_p5 = por %p69_p1, %p68_p0  ;;  %p106_p6 = scmp.eq.s32.totalorder %s414_s18, 3 }
  0x10   : > { %p777_p7 = por %p767_p3, %p74_p2  ;;  %p781_p8 = por %p100_p4, %p68_p0 }
  0x11   : > { %p785_p9 = por %p106_p6, %p74_p2  ;;  %p415_p10 = scmp.ge.s32.totalorder %s690_s16, 1 }
  0x12   : > { %s940_s22 = scalar_select %p777_p7, 1, 0 }
  0x13   : > { %s941_s23 = scalar_select %p781_p8, 1, 0 }
  0x14   : > { %s942_s24 = scalar_select %p785_p9, 1, 0 }
  0x15   : > { %p113_p11 = scmp.lt.s32.totalorder %s690_s16, 5  ;;  %s692_s26 = smov [#allocation2]  }
  0x16   : > { %943 = sst [smem:[#allocation14_spill]] %s942_s24  ;;  %s125_s27 = sshll.u32 %s692_s26, 4  ;;  %s126_s27 = int_to_ptr.vmem [resolvable:$true] %s125_s27 }
  0x17   : > { %p791_p12 = pnand %p415_p10, %p113_p11  ;;  %p459_p0 = scmp.lt.s32.totalorder %s690_s16, 4 }
  0x18   : > { %s547_s30 = scalar_lea.vmem %s126_s27, 256  ;;  %p555_p9 = scmp.lt.s32.totalorder %s126_s27, %s126_s27 }
  0x19   : > { %s944_s25 = scalar_select %p791_p12, 1, 0 }
  0x1a   : > { %p446_p13 = pneg %p791_p12  ;;  %p806_p2 = pnand %p459_p0, %p771_p5 }
  0x1b   : > { %p548_p6 = scmp.ne.s32.totalorder %s126_s27, %s547_s30  ;;  %p556_p8 = scmp.lt.s32.totalorder %s547_s30, %s547_s30 }
  0x1c   : > { %p800_p1 = pnand %p446_p13, %p767_p3 }
  0x1d   : > { %p557_p7 = por %p556_p8, %p555_p9 }
  0x1e   : > { %p538_p4 = pneg %p800_p1 }
  0x20   : > { %p550_p10 = pnand %p548_p6, %p538_p4 }
  0x22   : > { %p551_p11 = pneg %p550_p10 }
  0x24   : > { %p558_p12 = pnand %p557_p7, %p551_p11 }
  0x26   : > { %561 = shalt.err (!%p558_p12)
}
  0x27   : > { %s693_s3 = smov 128   ;;  %s694_s4 = smov 8  }
  0x28   : > { %s947_s0 = sld [smem:[#allocation16_spill]]  ;;  %s28_s7 = sadd.s32 1, %s682_s14 }
  0x29   : > { %p29_p5 = scmp.ge.s32.totalorder %s28_s7, 2  ;;  %s31_s8 = sadd.s32 1, %s686_s15 }
  0x2a   : > { %s139_s17 = sand.u32 1, %s670_s11   ;;  %s419_s18 = sshll.u32 %s682_s14, 1 }
  0x2b   : > { %s966_s7 = smov (%p29_p5, %s28_s7), 0  ;;  %s968_s8 = smov (!%p29_p5, %s31_s8), %s686_s15 }
  0x2c   : > { %948 = sst [smem:[#allocation15_spill]] %s966_s7  ;;  %s57_s21 = ssub.s32 %s682_s14, %s966_s7 }
  0x2d   : > { %p33_p7 = scmp.ge.s32.totalorder %s968_s8, 2  ;;  %s418_s26 = sshll.u32 %s139_s17, 5 }
  0x2e   : > { %449 = dma.hbm_to_vmem [thread:$0]  (!%p800_p1), %s947_s0, 256, %s126_s27, [#allocation3], %s693_s3, %s693_s3, %s694_s4  }
  0x2f   : > { %s420_s28 = sshll.u32 %s686_s15, 3  ;;  %s970_s8 = smov (%p33_p7, %s968_s8), 0 }
  0x30   : > { %s149_s27 = sadd.s32 %s420_s28, %s419_s18  ;;  %s143_s30 = scalar_lea.vmem [#allocation5], %s418_s26 }
  0x31   : > { %s152_s3 = sshll.u32 %s143_s30, 4  ;;  %s56_s4 = ssub.s32 %s686_s15, %s970_s8  ;;  %s153_s3 = int_to_ptr.vmem [resolvable:$true] %s152_s3 }
  0x32   : > { %s421_s5 = sshll.u32 %s149_s27, 7  ;;  %s58_s6 = sor.u32 %s57_s21, %s56_s4 }
  0x33   : > { %s151_s24 = scalar_lea.hbm %s923_s1, %s421_s5  ;;  %p59_p8 = scmp.eq.s32.totalorder %s58_s6, 0 }
  0x34   : > { %s949_s7 = sadd.s32 1, %s670_s11  ;;  %s140_s9 = scalar_lea.sflag [#allocation6], %s139_s17 }
  0x35   : > { %s837_s14 = scalar_select %p59_p8, %s670_s11, %s949_s7  }
  0x36   : > { %p564_p9 = pneg %p806_p2  ;;  %s575_s16 = scalar_lea.vmem %s153_s3, 512 }
  0x37   : > { %p576_p12 = scmp.ne.s32.totalorder %s153_s3, %s575_s16  ;;  %s695_s18 = smov [#allocation5]  }
  0x38   : > { %s580_s26 = sshll.u32 %s695_s18, 4  ;;  %s581_s26 = int_to_ptr.vmem [resolvable:$false] %s580_s26 }
  0x39   : > { %p578_p13 = pnand %p576_p12, %p564_p9  ;;  %s582_s21 = scalar_lea.vmem %s581_s26, 1024 }
  0x3a   : > { %p583_p1 = scmp.lt.s32.totalorder %s153_s3, %s581_s26  ;;  %p584_p4 = scmp.lt.s32.totalorder %s582_s21, %s575_s16 }
  0x3b   : > { %p579_p0 = pneg %p578_p13 }
  0x3c   : > { %p585_p6 = por %p584_p4, %p583_p1 }
  0x3e   : > { %p586_p10 = pnand %p585_p6, %p579_p0 }
  0x40   : > { %589 = shalt.err (!%p586_p10)
}
  0x41   : > { %s696_s0 = smov 512   ;;  %s697_s19 = smov 256  }
  0x42   : > { %s698_s7 = smov 16   ;;  %p950_p11 = scmp.ne.s32.totalorder %s944_s25, 0 }
  0x43   : > { %453 = dma.hbm_to_vmem [thread:$0]  (!%p806_p2), %s151_s24, 512, %s153_s3, %s140_s9, %s696_s0, %s697_s19, %s698_s7  }
  0x44   : > { %164 = sbr.rel (%p950_p11) target bundleno = 295 (0x127), region = 28 }
  0x49   : > { %649 = dma.done.wait (%p767_p3), [#allocation3], 256  }
  0x4a   : > { %651 = vsyncadd (%p767_p3), [#allocation3], 4294967040  ;;  %s850_s16 = sand.u32 1, %s666_s10   ;;  %p951_p2 = scmp.ne.s32.totalorder %s940_s22, 0 }
  0x4b   : > { %s424_s17 = sshll.u32 %s850_s16, 5  ;;  %s171_s28 = scalar_lea.sflag [#allocation6], %s850_s16 }
  0x4c   : > { %s174_s9 = scalar_lea.vmem [#allocation5], %s424_s17 }
  0x4d   : > { %653 = dma.done.wait (%p951_p2), %s171_s28, 512  }
  0x4e   : > { %655 = vsyncadd (%p951_p2), %s171_s28, 4294966784  ;;  %v699_v0 = vmov 0.0   ;;  %v200_v1 = vld [vmem:[%s174_s9 + $0x18] sm:$0xff]  ;;  %v199_v2 = vld [vmem:[%s174_s9 + $0x10] sm:$0xff]  ;;  %vm207_vm0 = vcmask 130048   ;;  %s429_s20 = sshll.u32 %s674_s12, 1 }
  0x4f   : > { %278 = vmatprep.mubr.f32.mxu0 %v699_v0  ;;  %284 = vmatprep.mubr.f32.mxu1 %v699_v0  ;;  %v198_v3 = vld [vmem:[%s174_s9 + $0x8] sm:$0xff]  ;;  %v204_v4 = vmax.f32 %v200_v1, 0.001  ;;  %v203_v5 = vmax.f32 %v199_v2, 0.001  ;;  %v197_v7 = vld [vmem:[%s174_s9] sm:$0xff] }
  0x50   : > { %v202_v6 = vmax.f32 %v198_v3, 0.001  ;;  %v201_v8 = vmax.f32 %v197_v7, 0.001  ;;  %v205_v9 = vld [vmem:[#allocation2] sm:$0xff]  ;;  %v206_v10 = vld [vmem:[#allocation2 + $0x8] sm:$0xff] }
  0x51   : > { %242 = vmatprep.subr.mxu0 %v204_v4  ;;  %434 = vmatprep.subr.mxu1 %v204_v4  ;;  %s430_s22 = sshll.u32 %s678_s13, 3  ;;  %s194_s25 = scalar_lea.vmem [#allocation7], %s424_s17 }
  0x52   : > { %243 = vmatpush1.msra.mxu0 %v203_v5  ;;  %436 = vmatpush1.msra.mxu1 %v203_v5  ;;  %s308_s24 = sadd.s32 %s430_s22, %s429_s20  ;;  %s311_s29 = sshll.u32 %s194_s25, 4  ;;  %s864_s29 = int_to_ptr.vmem [resolvable:$true] %s311_s29 }
  0x53   : > { %244 = vmatprep.subr.mxu0 %v202_v6  ;;  %435 = vmatprep.subr.mxu1 %v202_v6  ;;  %s431_s27 = sshll.u32 %s308_s24, 7  ;;  %s296_s12 = scalar_lea.sflag [#allocation4], %s850_s16 }
  0x54   : > { %245 = vmatpush1.msra.mxu0 %v201_v8  ;;  %437 = vmatpush1.msra.mxu1 %v201_v8  ;;  %s869_s4 = scalar_lea.hbm %s924_s2, %s431_s27  ;;  %s590_s13 = scalar_lea.vmem %s864_s29, 512 }
  0x55   : > { %426 = vmatmul.mubr.msk.f32.vlgmr.msra.gmra.mxu0 %vm207_vm0, %v205_v9  ;;  %427 = vmatmul.mubr.msk.f32.vlgmr.msra.gmra.mxu1 %vm207_vm0, %v206_v10  ;;  %p591_p3 = scmp.ne.s32.totalorder %s864_s29, %s590_s13  ;;  %p952_p5 = scmp.ne.s32.totalorder %s941_s23, 0 }
  0x56   : > { %s700_s5 = smov [#allocation7]  }
  0x57   : > { %p592_p7 = pnand %p591_p3, %p952_p5  ;;  %s594_s6 = sshll.u32 %s700_s5, 4  ;;  %s595_s6 = int_to_ptr.vmem [resolvable:$false] %s594_s6 }
  0x58   : > { %s596_s18 = scalar_lea.vmem %s595_s6, 1024  ;;  %p597_p9 = scmp.lt.s32.totalorder %s864_s29, %s595_s6 }
  0x59   : > { %p593_p8 = pneg %p592_p7  ;;  %p598_p12 = scmp.lt.s32.totalorder %s596_s18, %s590_s13 }
  0x5b   : > { %p599_p13 = por %p598_p12, %p597_p9 }
  0x5d   : > { %p600_p0 = pnand %p599_p13, %p593_p8 }
 0x115   : > { %v280_v11 = vpop.f32.mrf.mxu0  ;;  %v286_v12 = vpop.f32.mrf.mxu1 }
 0x116   : > { %291 = vst [vmem:[%s194_s25] sm:$0xff] %v280_v11  ;;  %293 = vst [vmem:[%s194_s25 + $0x10] sm:$0xff] %v286_v12 }
 0x117   : > { %v282_v13 = vpop.f32.mrf.mxu0  ;;  %v288_v14 = vpop.f32.mrf.mxu1 }
 0x118   : > { %292 = vst [vmem:[%s194_s25 + $0x8] sm:$0xff] %v282_v13  ;;  %294 = vst [vmem:[%s194_s25 + $0x18] sm:$0xff] %v288_v14 }
 0x119   : > { %603 = shalt.err (!%p600_p0)
}
 0x11a   : > { %s604_s26 = scalar_lea.hbm %s869_s4, 512  ;;  %s608_s19 = scalar_lea.hbm %s924_s2, 2048 }
 0x11b   : > { %p605_p1 = scmp.ne.s32.totalorder %s869_s4, %s604_s26  ;;  %p609_p10 = scmp.lt.s32.totalorder %s869_s4, %s924_s2 }
 0x11c   : > { %p610_p11 = scmp.lt.s32.totalorder %s608_s19, %s604_s26 }
 0x11d   : > { %p606_p4 = pnand %p605_p1, %p952_p5 }
 0x11e   : > { %p611_p2 = por %p610_p11, %p609_p10 }
 0x11f   : > { %p607_p6 = pneg %p606_p4 }
 0x121   : > { %p612_p3 = pnand %p611_p2, %p607_p6 }
 0x123   : > { %615 = shalt.err (!%p612_p3)
}
 0x124   : > { %s701_s28 = smov 256   ;;  %s702_s9 = smov 512  }
 0x125   : > { %s703_s20 = smov 16  }
 0x126   : > { %444 = dma.vmem_to_hbm [thread:$0]  (%p952_p5), %s864_s29, 512, %s869_s4, %s296_s12, %s701_s28, %s702_s9, %s703_s20  }
 0x127 PF: > { %s953_s22 = sld [smem:[#allocation13_spill]] }
 0x128   : > { %s954_s24 = sld [smem:[#allocation11_spill]] }
 0x129   : > { %s955_s25 = sld [smem:[#allocation14_spill]] }
 0x12d   : > { %p461_p7 = scmp.ge.s32.totalorder %s953_s22, 2 }
 0x12e   : > { %s326_s27 = sand.u32 1, %s954_s24  }
 0x12f   : > { %p956_p8 = scmp.ne.s32.totalorder %s955_s25, 0  ;;  %s327_s30 = scalar_lea.sflag [#allocation4], %s326_s27 }
 0x131   : > { %p455_p9 = pnand %p461_p7, %p956_p8 }
 0x133   : > { %p456_p12 = pneg %p455_p9 }
 0x135   : > { %657 = dma.done.wait (%p456_p12), %s327_s30, 512  }
 0x136   : > { %659 = vsyncadd (%p456_p12), %s327_s30, 4294966784  ;;  %s19_s16 = sadd.s32 1, %s953_s22   ;;  %s957_s12 = sld [smem:[#allocation12_spill]] }
 0x137   : > { %p16_p13 = scmp.ge.s32.totalorder %s19_s16, 6   ;;  %s958_s23 = sld [smem:[#allocation15_spill]] }
 0x138   : > { %s959_s9 = smov %s666_s10  ;;  %s960_s10 = smov %s670_s11 }
 0x139   : > { %s961_s11 = smov %s837_s14  ;;  %s962_s13 = smov %s686_s15 }
 0x13a   : > { %s964_s15 = smov %s970_s8  ;;  %18 = sbr.rel (!%p16_p13) target bundleno = 10 (0xa), region = 78 }
 0x13d   : > { %s963_s14 = smov %s958_s23 }
 0x13f   :  { %332 = vsyncpa [#allocation3], 1 }
 0x140   :  { %334 = vsyncpa [#allocation3 + $0x1], 1 }
 0x141   :  { %335 = vsyncpa [#allocation6], 1 }
 0x142   :  { %337 = vsyncpa [#allocation6 + $0x1], 1 }
 0x143   :  { %338 = vsyncpa [#allocation4], 1 }
 0x144   :  { %340 = vsyncpa [#allocation4 + $0x1], 1 }

</bundles_post_ra>
